<compile_context>
chip_gen: v7x
topology: tpu7x:2x2x1
jax: 0.10.0
libtpu: 0.0.40
codegen_flags: <defaults>
</compile_context>

<pallas_src>
import functools

import jax
import jax.numpy as jnp
from jax.experimental import pallas as pl
from jax.experimental.pallas import tpu as pltpu


# ---------------------------------------------------------------------------
# Pallas kernels
# ---------------------------------------------------------------------------

def _conv_bn_relu_kernel(w_ref, scale_ref, bias_ref, p_ref, o_ref):
    """o = relu((W @ P) * scale + bias)  -- conv-as-matmul + BN + ReLU.

    w_ref:     (Co, Kp)   folded 3x3 conv weight (Kp = Cin*9 padded to x8)
    scale_ref: (Co, 1)    BN scale  = gamma / sqrt(var + eps)
    bias_ref:  (Co, 1)    BN bias   = beta - mean * scale
    p_ref:     (Kp, TM)   im2col patches, lane-dense (TM = N*Ho*Wo)
    o_ref:     (Co, TM)   lane-dense output
    """
    y = jnp.dot(w_ref[...], p_ref[...], preferred_element_type=jnp.float32)
    y = y * scale_ref[...] + bias_ref[...]
    o_ref[...] = jnp.maximum(y, 0.0).astype(o_ref.dtype)


def _conv_bn_add_relu_kernel(w_ref, scale_ref, bias_ref, p_ref, id_ref, o_ref,
                             *, pad):
    """o = relu((W @ P) * scale + bias + channel_pad(identity)).

    The option-A shortcut (already spatially subsampled, lane-dense (C_id, TM))
    is zero-padded on the channel (sublane) axis in-register and added once; the
    output block is stored exactly once (no full-block zero + overwrite).
    """
    y = jnp.dot(w_ref[...], p_ref[...], preferred_element_type=jnp.float32)
    y = y * scale_ref[...] + bias_ref[...]

    ident = id_ref[...].astype(jnp.float32)
    c_out = o_ref.shape[0]
    c_id, tm = ident.shape
    rem = c_out - pad - c_id
    parts = []
    if pad > 0:
        parts.append(jnp.zeros((pad, tm), jnp.float32))
    parts.append(ident)
    if rem > 0:
        parts.append(jnp.zeros((rem, tm), jnp.float32))
    if len(parts) > 1:
        ident = jnp.concatenate(parts, axis=0)

    o_ref[...] = jnp.maximum(y + ident, 0.0).astype(o_ref.dtype)


# ---------------------------------------------------------------------------
# Wrappers (layout plumbing only: im2col, stride-2 gather, reshapes)
# ---------------------------------------------------------------------------

def _round_up(v, m):
    return (v + m - 1) // m * m


def _im2col_3x3(x, stride):
    """(N, C, H, W) -> patches (C*9, N*Ho*Wo) for a 3x3 conv, padding=1."""
    n, c, h, w = x.shape
    ho = (h + 2 - 3) // stride + 1
    wo = (w + 2 - 3) // stride + 1
    xp = jnp.pad(x, ((0, 0), (0, 0), (1, 1), (1, 1)))
    taps = []
    for kh in range(3):
        for kw in range(3):
            taps.append(xp[:, :,
                           kh:kh + stride * (ho - 1) + 1:stride,
                           kw:kw + stride * (wo - 1) + 1:stride])
    p = jnp.stack(taps, axis=2)                            # (N, C, 9, Ho, Wo)
    p = p.transpose(1, 2, 0, 3, 4).reshape(c * 9, n * ho * wo)
    return p, ho, wo


def _conv3x3_bn_act(x, w, scale, bias, stride, identity=None, pad=0):
    """Fused 3x3 conv (padding=1) + inference BN + optional shortcut-add + ReLU."""
    n, c_in, _, _ = x.shape
    c_out = w.shape[0]

    p, ho, wo = _im2col_3x3(x, stride)
    m = n * ho * wo
    k = c_in * 9
    kp = _round_up(k, 8)                                   # align sublane dim
    if kp != k:
        p = jnp.pad(p, ((0, kp - k), (0, 0)))
    w_mat = w.reshape(c_out, k)
    if kp != k:
        w_mat = jnp.pad(w_mat, ((0, 0), (0, kp - k)))

    scale2 = scale.reshape(c_out, 1).astype(jnp.float32)
    bias2 = bias.reshape(c_out, 1).astype(jnp.float32)

    # One big block per grid step (everything here is a few KiB, far below the
    # scoped VMEM limit on v5e/v6e/v7x).  Larger problems would tile over M.
    tm = m
    grid = (m // tm,)

    flops = 2 * c_out * kp * m
    bytes_acc = 4 * (c_out * kp + 2 * c_out + kp * m + c_out * m)

    if identity is None:
        kernel = _conv_bn_relu_kernel
        in_specs = [
            pl.BlockSpec((c_out, kp), lambda j: (0, 0)),
            pl.BlockSpec((c_out, 1), lambda j: (0, 0)),
            pl.BlockSpec((c_out, 1), lambda j: (0, 0)),
            pl.BlockSpec((kp, tm), lambda j: (0, j)),
        ]
        args = (w_mat, scale2, bias2, p)
    else:
        c_id = identity.shape[0]
        kernel = functools.partial(_conv_bn_add_relu_kernel, pad=pad)
        in_specs = [
            pl.BlockSpec((c_out, kp), lambda j: (0, 0)),
            pl.BlockSpec((c_out, 1), lambda j: (0, 0)),
            pl.BlockSpec((c_out, 1), lambda j: (0, 0)),
            pl.BlockSpec((kp, tm), lambda j: (0, j)),
            pl.BlockSpec((c_id, tm), lambda j: (0, j)),
        ]
        args = (w_mat, scale2, bias2, p, identity.astype(jnp.float32))
        bytes_acc += 4 * c_id * m

    out_flat = pl.pallas_call(
        kernel,
        out_shape=jax.ShapeDtypeStruct((c_out, m), x.dtype),
        grid=grid,
        in_specs=in_specs,
        out_specs=pl.BlockSpec((c_out, tm), lambda j: (0, j)),
        compiler_params=pltpu.CompilerParams(
            dimension_semantics=("parallel",)),
        cost_estimate=pl.CostEstimate(
            flops=flops, transcendentals=0, bytes_accessed=bytes_acc),
    )(*args)

    # lane-dense (Co, N*Ho*Wo) -> NCHW
    return out_flat.reshape(c_out, n, ho, wo).transpose(1, 0, 2, 3)


def _bn_scale_bias(gamma, beta, mean, var, eps=1e-5):
    scale = gamma / jnp.sqrt(var + eps)
    return scale, beta - mean * scale


def basic_block_forward(x, params, stride=1, option="A"):
    """Forward of BasicBlock: conv1-bn1-relu, conv2-bn2, (+option-A shortcut), relu."""
    # TODO(synk): training-mode BatchNorm (batch statistics / running-stat update) not implemented;
    # inference-mode running statistics are folded into per-channel scale/bias.
    in_planes = x.shape[1]
    planes = params["conv1_w"].shape[0]

    s1, b1 = _bn_scale_bias(params["bn1_gamma"], params["bn1_beta"],
                            params["bn1_mean"], params["bn1_var"])
    s2, b2 = _bn_scale_bias(params["bn2_gamma"], params["bn2_beta"],
                            params["bn2_mean"], params["bn2_var"])

    # Fused kernel #1: conv1 + bn1 + relu1
    out1 = _conv3x3_bn_act(x, params["conv1_w"], s1, b1, stride)

    # Option-A LambdaLayer shortcut, prepared wrapper-side as a lane-dense
    # (C_id, N*Ho*Wo) slab: the ::2 spatial gather happens here (XLA), so the
    # kernel body has no strided VMEM slicing; the channel zero-pad is fused
    # into the residual add of kernel #2.
    if stride != 1 or in_planes != planes:
        if option != "A":
            # TODO(synk): option='B' (1x1 conv + BN) shortcut not implemented.
            raise NotImplementedError("only option='A' shortcut is implemented")
        sub = x[:, :, ::2, ::2]
        pad = planes // 4
    else:
        sub = x
        pad = 0
    n, c_id, hs, ws = sub.shape
    identity = sub.transpose(1, 0, 2, 3).reshape(c_id, n * hs * ws)

    # Fused kernel #2: conv2 + bn2 + shortcut-add + relu2
    return _conv3x3_bn_act(out1, params["conv2_w"], s2, b2, 1,
                           identity=identity, pad=pad)


# ---------------------------------------------------------------------------
# Pure-JAX reference and demo
# ---------------------------------------------------------------------------

def _reference_basic_block(x, params, stride=1):
    def conv(v, w, s):
        return jax.lax.conv_general_dilated(
            v, w, window_strides=(s, s), padding=((1, 1), (1, 1)),
            dimension_numbers=("NCHW", "OIHW", "NCHW"),
            precision=jax.lax.Precision.HIGHEST)

    def bn(v, g, b, m, var, eps=1e-5):
        s = g / jnp.sqrt(var + eps)
        return v * s[None, :, None, None] + (b - m * s)[None, :, None, None]

    out = jax.nn.relu(bn(conv(x, params["conv1_w"], stride),
                         params["bn1_gamma"], params["bn1_beta"],
                         params["bn1_mean"], params["bn1_var"]))
    out = bn(conv(out, params["conv2_w"], 1),
             params["bn2_gamma"], params["bn2_beta"],
             params["bn2_mean"], params["bn2_var"])
    in_planes, planes = x.shape[1], params["conv1_w"].shape[0]
    if stride != 1 or in_planes != planes:
        pad = planes // 4
        identity = jnp.pad(x[:, :, ::2, ::2],
                           ((0, 0), (pad, pad), (0, 0), (0, 0)))
    else:
        identity = x
    return jax.nn.relu(out + identity)


if __name__ == "__main__":
    key = jax.random.PRNGKey(0)
    ks = jax.random.split(key, 11)
    n, in_planes, planes, h, w, stride = 2, 4, 8, 16, 16, 2

    x = jax.random.normal(ks[0], (n, in_planes, h, w), dtype=jnp.float32)
    params = {
        "conv1_w": 0.1 * jax.random.normal(ks[1], (planes, in_planes, 3, 3), jnp.float32),
        "bn1_gamma": 1.0 + 0.1 * jax.random.normal(ks[2], (planes,), jnp.float32),
        "bn1_beta": 0.1 * jax.random.normal(ks[3], (planes,), jnp.float32),
        "bn1_mean": 0.1 * jax.random.normal(ks[4], (planes,), jnp.float32),
        "bn1_var": 0.5 + jnp.abs(jax.random.normal(ks[5], (planes,), jnp.float32)),
        "conv2_w": 0.1 * jax.random.normal(ks[6], (planes, planes, 3, 3), jnp.float32),
        "bn2_gamma": 1.0 + 0.1 * jax.random.normal(ks[7], (planes,), jnp.float32),
        "bn2_beta": 0.1 * jax.random.normal(ks[8], (planes,), jnp.float32),
        "bn2_mean": 0.1 * jax.random.normal(ks[9], (planes,), jnp.float32),
        "bn2_var": 0.5 + jnp.abs(jax.random.normal(ks[10], (planes,), jnp.float32)),
    }

    out = basic_block_forward(x, params, stride=stride, option="A")
    out = jax.block_until_ready(out)

    ref = _reference_basic_block(x, params, stride=stride)
    assert out.shape == (n, planes, h // 2, w // 2), out.shape
    err = float(jnp.max(jnp.abs(out - ref)))
    assert err < 5e-2, f"mismatch vs reference, max abs err = {err}"

    print("KERNEL_OK")
</pallas_src>

<mosaic_0001>
module attributes {stable_mosaic.version = 11 : i64} {
  func.func @_conv_bn_relu_kernel(%arg0: i32, %arg1: memref<8x40xf32, #tpu.memory_space<vmem>>, %arg2: memref<8x1xf32, #tpu.memory_space<vmem>>, %arg3: memref<8x1xf32, #tpu.memory_space<vmem>>, %arg4: memref<40x128xf32, #tpu.memory_space<vmem>>, %arg5: memref<8x128xf32, #tpu.memory_space<vmem>>) attributes {dimension_semantics = [#tpu.dimension_semantics<parallel>], iteration_bounds = array<i64: 1>, scalar_prefetch = 0 : i64, scratch_operands = 0 : i64, tpu.core_type = #tpu.core_type<tc>, window_params = [{pipeline_mode = #tpu.pipeline_mode<synchronous>, transform_indices = @transform_0, window_bounds = array<i64: 8, 40>}, {pipeline_mode = #tpu.pipeline_mode<synchronous>, transform_indices = @transform_1, window_bounds = array<i64: 8, 1>}, {pipeline_mode = #tpu.pipeline_mode<synchronous>, transform_indices = @transform_2, window_bounds = array<i64: 8, 1>}, {transform_indices = @transform_3, window_bounds = array<i64: 40, 128>}, {transform_indices = @transform_4, window_bounds = array<i64: 8, 128>}]} {
    %c0 = arith.constant 0 : index
    %c0_0 = arith.constant 0 : index
    %0 = vector.load %arg1[%c0, %c0_0] : memref<8x40xf32, #tpu.memory_space<vmem>>, vector<8x40xf32>
    %c0_1 = arith.constant 0 : index
    %c0_2 = arith.constant 0 : index
    %1 = vector.load %arg4[%c0_1, %c0_2] : memref<40x128xf32, #tpu.memory_space<vmem>>, vector<40x128xf32>
    %cst = arith.constant dense<0.000000e+00> : vector<8x128xf32>
    %2 = tpu.matmul %0, %1, %cst {dimension_numbers = #tpu.dot_dimension_numbers<[1], [0], [0], [1], [0, 0, 1, 1], [], []>} : vector<8x40xf32>, vector<40x128xf32>, vector<8x128xf32> -> vector<8x128xf32>
    %c0_3 = arith.constant 0 : index
    %c0_4 = arith.constant 0 : index
    %3 = vector.load %arg2[%c0_3, %c0_4] : memref<8x1xf32, #tpu.memory_space<vmem>>, vector<8x1xf32>
    %4 = vector.broadcast %3 : vector<8x1xf32> to vector<8x128xf32>
    %5 = arith.mulf %2, %4 : vector<8x128xf32>
    %c0_5 = arith.constant 0 : index
    %c0_6 = arith.constant 0 : index
    %6 = vector.load %arg3[%c0_5, %c0_6] : memref<8x1xf32, #tpu.memory_space<vmem>>, vector<8x1xf32>
    %7 = vector.broadcast %6 : vector<8x1xf32> to vector<8x128xf32>
    %8 = arith.addf %5, %7 : vector<8x128xf32>
    %cst_7 = arith.constant 0.000000e+00 : f32
    %9 = vector.broadcast %cst_7 : f32 to vector<8x128xf32>
    %10 = arith.maximumf %8, %9 : vector<8x128xf32>
    %c0_8 = arith.constant 0 : index
    %c0_9 = arith.constant 0 : index
    %11 = vector.load %arg5[%c0_8, %c0_9] : memref<8x128xf32, #tpu.memory_space<vmem>>, vector<8x128xf32>
    tpu.vector_store %arg5[%c0_8, %c0_9], %10 {strides = array<i32>} : memref<8x128xf32, #tpu.memory_space<vmem>>, vector<8x128xf32>,
    return
  }
  func.func @transform_0(%arg0: i32) -> (i32, i32) {
    %c0_i32 = arith.constant 0 : i32
    %c0_i32_0 = arith.constant 0 : i32
    %c0_i32_1 = arith.constant 0 : i32
    return %c0_i32, %c0_i32_0 : i32, i32
  }
  func.func @transform_1(%arg0: i32) -> (i32, i32) {
    %c0_i32 = arith.constant 0 : i32
    %c0_i32_0 = arith.constant 0 : i32
    %c0_i32_1 = arith.constant 0 : i32
    return %c0_i32, %c0_i32_0 : i32, i32
  }
  func.func @transform_2(%arg0: i32) -> (i32, i32) {
    %c0_i32 = arith.constant 0 : i32
    %c0_i32_0 = arith.constant 0 : i32
    %c0_i32_1 = arith.constant 0 : i32
    return %c0_i32, %c0_i32_0 : i32, i32
  }
  func.func @transform_3(%arg0: i32) -> (i32, i32) {
    %c0_i32 = arith.constant 0 : i32
    %c0_i32_0 = arith.constant 0 : i32
    return %c0_i32, %arg0 : i32, i32
  }
  func.func @transform_4(%arg0: i32) -> (i32, i32) {
    %c0_i32 = arith.constant 0 : i32
    %c0_i32_0 = arith.constant 0 : i32
    return %c0_i32, %arg0 : i32, i32
  }
}

</mosaic_0001>

<bundles_post_ra>
// kernel: tpu_custom_call.1
= control target key start
LH: loop header
LB: loop body
LE: loop exit
PB: predicated region body
PF: predicated region fallthrough
CT: control target
= control target key end

     0   :  { %9 = vsyncpa [#allocation3], 0  ;;  %s292_s0 = inlined_call_operand.vmem [shape: f32[8,40], index: 0, kind: input, shape index: {}]   ;;  %s293_s1 = inlined_call_operand.vmem [shape: f32[8,1], index: 1, kind: input, shape index: {}]   ;;  %s294_s2 = inlined_call_operand.vmem [shape: f32[8,1], index: 2, kind: input, shape index: {}]   ;;  %s295_s3 = inlined_call_operand.hbm [shape: f32[40,128], index: 3, kind: input, shape index: {}]   ;;  %s296_s4 = inlined_call_operand.hbm [shape: f32[8,128], index: 4, kind: output, shape index: {}]  }
   0x1   :  { %10 = vsyncpa [#allocation4], 0  ;;  %s226_s15 = smov [#allocation2]   ;;  %s178_s19 = scalar_lea.hbm %s295_s3, 640 }
   0x2   :  { %s22_s16 = sshll.u32 %s226_s15, 4  ;;  %p179_p0 = scmp.ne.s32.totalorder %s295_s3, %s178_s19  ;;  %s23_s16 = int_to_ptr.vmem [resolvable:$true] %s22_s16 }
   0x3   :  { %p182_p1 = scmp.lt.u32.totalorder %s178_s19, %s295_s3 }
   0x5   :  { %p184_p2 = pnand %p182_p1, %p179_p0 }
   0x7   :  { %187 = shalt.err (!%p184_p2)
}
   0x8   :  { %s188_s24 = scalar_lea.vmem %s23_s16, 640  ;;  %p193_p4 = scmp.lt.s32.totalorder %s23_s16, %s23_s16 }
   0x9   :  { %p189_p3 = scmp.ne.s32.totalorder %s23_s16, %s188_s24  ;;  %p194_p5 = scmp.lt.s32.totalorder %s188_s24, %s188_s24 }
   0xb   :  { %p195_p6 = por %p194_p5, %p193_p4 }
   0xd   :  { %p196_p7 = pnand %p195_p6, %p189_p3 }
   0xf   :  { %199 = shalt.err (!%p196_p7)
}
  0x10   :  { %s227_s25 = smov 128   ;;  %s228_s26 = smov 8  }
  0x11   :  { %28 = dma.hbm_to_vmem [thread:$0]  %s295_s3, 640, %s23_s16, [#allocation3], %s227_s25, %s227_s25, %s228_s26  }
  0x12   :  { %222 = dma.done.wait [#allocation3], 640  }
  0x13   :  { %223 = vsyncadd [#allocation3], 4294966656  ;;  %v229_v0 = vmov 0.0|0.0   ;;  %vm230_vm0 = vmmov 0   ;;  %v231_v1 = vmov 0.0   ;;  %v232_v2 = vmov 0  }
  0x14   :  { %163 = vmatprep.subr.bf16.mxu0 %v229_v0  ;;  %160 = vmatprep.mubr.msk.f32.mxu0 %vm230_vm0, %v231_v1  ;;  %v33_v3 = vld [vmem:[#allocation2] sm:$0xff]  ;;  %v34_v4 = vld [vmem:[#allocation2 + $0x8] sm:$0xff]  ;;  %v35_v5 = vld [vmem:[#allocation2 + $0x10] sm:$0xff]  ;;  %vm38_vm1 = vcmask 326656  }
  0x15   :  { %177 = vset.pattern.permute.xlu0 %v232_v2  ;;  %v164_v6 = vpack.c.bf16 %v34_v4, %v33_v3  ;;  %v36_v7 = vld [vmem:[#allocation2 + $0x18] sm:$0xff]  ;;  %v112_v8 = vld [vmem:[%s293_s1] sm:$0xff]  ;;  %s233_s1 = smov [#allocation5]  }
  0x16   :  { %v167_v9 = vpack.c.bf16 %v36_v7, %v35_v5  ;;  %115 = vperm.xlu0 %177, %v112_v8   ;;  %v119_v10 = vld [vmem:[%s294_s2] sm:$0xff]  ;;  %s134_s8 = sshll.u32 %s233_s1, 4  ;;  %s135_s8 = int_to_ptr.vmem [resolvable:$true] %s134_s8 }
  0x17   :  { %165 = vmatpush3.bf16.msra.mxu0 %v164_v6  ;;  %v37_v11 = vld [vmem:[#allocation2 + $0x20] sm:$0xff]  ;;  %s200_s2 = scalar_lea.vmem %s135_s8, 128  ;;  %p205_p9 = scmp.lt.s32.totalorder %s135_s8, %s135_s8 }
  0x18   :  { %166 = vmatprep.subr.bf16.mxu0 %v229_v0  ;;  %v32_v12 = vld [vmem:[%s292_s0] sm:$0xff]  ;;  %p201_p8 = scmp.ne.s32.totalorder %s135_s8, %s200_s2  ;;  %p206_p10 = scmp.lt.s32.totalorder %s200_s2, %s200_s2 }
  0x1a   :  { %122 = vperm.xlu0 %177, %v119_v10   ;;  %p207_p11 = por %p206_p10, %p205_p9 }
  0x1b   :  { %168 = vmatpush3.bf16.msra.mxu0 %v167_v9 }
  0x1c   :  { %158 = vmatprep.subr.mxu0 %v231_v1  ;;  %p208_p12 = pnand %p207_p11, %p201_p8 }
  0x1f   :  { %159 = vmatpush3.msra.mxu0 %v37_v11 }
  0x20   :  { %161 = vmatmul.mubr.msk.f32.vlgmr.msra.gmra.mrb[0].mxu0 %vm38_vm1, %v32_v12 }
  0x95   :  { %v116_v13 = vpop.permute.xlu0 %115 }
  0x99   :  { %v123_v17 = vpop.permute.xlu0 %122 }
  0xf3   :  { %v108_v14 = vpop.f32.mrb[0].mxu0 }
  0xf4   :  { %v118_v15 = vmul.f32 %v116_v13, %v108_v14  ;;  %v162_v16 = vpop.f32.mrb[1].mxu0 }
  0xf6   :  { %v125_v18 = vadd.f32 %v123_v17, %v118_v15 }
  0xf8   :  { %v126_v19 = vmax.f32 %v125_v18, 0.0 }
  0xfa   :  { %127 = vst [vmem:[#allocation5] sm:$0xff] %v126_v19 }
  0xfb   :  { %211 = shalt.err (!%p208_p12)
}
  0xfc   :  { %s212_s10 = scalar_lea.hbm %s296_s4, 128 }
  0xfd   :  { %p213_p13 = scmp.ne.s32.totalorder %s296_s4, %s212_s10  ;;  %p216_p0 = scmp.lt.u32.totalorder %s212_s10, %s296_s4 }
  0xff   :  { %p218_p1 = pnand %p216_p0, %p213_p13 }
 0x101   :  { %221 = shalt.err (!%p218_p1)
}
 0x102   :  { %137 = dma.vmem_to_hbm [thread:$0]  %s135_s8, 128, %s296_s4, [#allocation4]  }
 0x103   :  { %224 = dma.done.wait [#allocation4], 128  }
 0x104   :  { %225 = vsyncadd [#allocation4], 4294967168 }
 0x105   :  { %141 = vsyncpa [#allocation3], 1 }
 0x106   :  { %142 = vsyncpa [#allocation4], 1 }

</bundles_post_ra>
